<compile_context>
chip_gen: v6e
topology: v6e:2x2x1
jax: 0.10.0
libtpu: 0.0.40
codegen_flags: <defaults>
</compile_context>

<pallas_src>
import math
import functools

import jax
import jax.numpy as jnp
from jax.experimental import pallas as pl
from jax.experimental.pallas import tpu as pltpu


def _round_up(x, m):
    return ((x + m - 1) // m) * m


def _cdiv(a, b):
    return -(-a // b)


# ------------------------- device-dependent limits -------------------------

def _detect_device():
    """(tile caps, vmem limit, #TensorCores/chip) from the attached TPU."""
    try:
        kind = jax.devices()[0].device_kind.lower()
    except Exception:
        kind = ""
    if "v6" in kind:
        # 128 MiB VMEM, 918 TF/s MXU: big tiles cut HBM re-reads.
        return (1024, 1024, 1024), 64 << 20, 1
    if "v7" in kind or "7x" in kind:
        # 64 MiB physical VMEM, 2 TensorCores/chip: keep working set small.
        return (512, 512, 1024), 48 << 20, 2
    # v5e / unknown: conservative tiles (~8 MiB working set), raised limit.
    return (512, 512, 1024), 48 << 20, 1


_TILE_CAPS, _VMEM_LIMIT, _NUM_TC = _detect_device()


def _plan_dim(size, align, cap):
    """Pick (padded, tile) with padded % tile == 0, tile % align == 0,
    tile <= max(cap, align), and padding bounded by the alignment per block
    (never pads up to a full tile cap)."""
    cap = max(cap, align)
    pmin = _round_up(size, align)
    nb = _cdiv(pmin, cap)
    tile = _round_up(_cdiv(pmin, nb), align)
    return tile * nb, tile


# ----------------------------- Pallas kernels -----------------------------

def _mm_kernel_single_k(x_ref, w_ref, o_ref):
    # Whole K in one tile: write straight to output (no accumulator).
    o_ref[...] = jnp.dot(
        x_ref[...].astype(jnp.bfloat16), w_ref[...],
        preferred_element_type=jnp.float32,
    ).astype(o_ref.dtype)


def _mm_kernel_multi_k_f32out(x_ref, w_ref, o_ref):
    # f32 output: accumulate directly into the resident output block
    # (no acc scratch, no final copy).
    @pl.when(pl.program_id(2) == 0)
    def _():
        o_ref[...] = jnp.zeros_like(o_ref)

    o_ref[...] += jnp.dot(
        x_ref[...].astype(jnp.bfloat16), w_ref[...],
        preferred_element_type=jnp.float32,
    )


def _mm_kernel_multi_k_acc(x_ref, w_ref, o_ref, acc_ref):
    # Narrow output dtype: keep an f32 accumulator, finalize on last K step.
    @pl.when(pl.program_id(2) == 0)
    def _():
        acc_ref[...] = jnp.zeros_like(acc_ref)

    acc_ref[...] += jnp.dot(
        x_ref[...].astype(jnp.bfloat16), w_ref[...],
        preferred_element_type=jnp.float32,
    )

    @pl.when(pl.program_id(2) == pl.num_programs(2) - 1)
    def _():
        o_ref[...] = acc_ref[...].astype(o_ref.dtype)


def _pallas_matmul(x, rhs, *, tm, tn, tk, out_dtype):
    """Tiled Y = X @ RHS.  Shapes must already be multiples of the tiles."""
    M, K = x.shape
    K2, N = rhs.shape
    assert K == K2
    assert M % tm == 0 and N % tn == 0 and K % tk == 0
    out_dtype = jnp.dtype(out_dtype)

    if K == tk:
        # Single K step: 2-D grid, no reduction axis.
        return pl.pallas_call(
            _mm_kernel_single_k,
            out_shape=jax.ShapeDtypeStruct((M, N), out_dtype),
            grid_spec=pltpu.PrefetchScalarGridSpec(
                num_scalar_prefetch=0,
                grid=(M // tm, N // tn),
                in_specs=[
                    pl.BlockSpec((tm, tk), lambda i, j: (i, 0)),
                    pl.BlockSpec((tk, tn), lambda i, j: (0, j)),
                ],
                out_specs=pl.BlockSpec((tm, tn), lambda i, j: (i, j)),
            ),
            compiler_params=pltpu.CompilerParams(
                dimension_semantics=("parallel", "parallel"),
                vmem_limit_bytes=_VMEM_LIMIT,
            ),
        )(x, rhs)

    if out_dtype == jnp.dtype(jnp.float32):
        kernel = _mm_kernel_multi_k_f32out
        scratch = []
    else:
        kernel = _mm_kernel_multi_k_acc
        scratch = [pltpu.VMEM((tm, tn), jnp.float32)]

    return pl.pallas_call(
        kernel,
        out_shape=jax.ShapeDtypeStruct((M, N), out_dtype),
        grid_spec=pltpu.PrefetchScalarGridSpec(
            num_scalar_prefetch=0,
            grid=(M // tm, N // tn, K // tk),
            in_specs=[
                pl.BlockSpec((tm, tk), lambda i, j, k: (i, k)),
                pl.BlockSpec((tk, tn), lambda i, j, k: (k, j)),
            ],
            out_specs=pl.BlockSpec((tm, tn), lambda i, j, k: (i, j)),
            scratch_shapes=scratch,
        ),
        compiler_params=pltpu.CompilerParams(
            dimension_semantics=("parallel", "parallel", "arbitrary"),
            vmem_limit_bytes=_VMEM_LIMIT,
        ),
    )(x, rhs)


# --------------------------- wrapper / module ------------------------------

def _padded_matmul(x2d, rhs_padded, n_out, out_dtype):
    """Y[:, :n_out] = X @ RHS (RHS already bf16 + padded to 128-multiples)."""
    M, K = x2d.shape
    Kp, Np = rhs_padded.shape
    tm_cap, tn_cap, tk_cap = _TILE_CAPS
    _, tk = _plan_dim(Kp, 128, tk_cap)
    _, tn = _plan_dim(Np, 128, tn_cap)
    Mp, tm = _plan_dim(M, 16, tm_cap)

    # v7x: guarantee >=2 blocks along a parallel axis so both TCs run.
    if _NUM_TC >= 2 and Mp == tm and Np == tn and Mp >= 32:
        Mp, tm = _plan_dim(M, 16, _round_up(_cdiv(Mp, 2), 16))

    if (Mp, Kp) != (M, K):
        # fused cast+pad: one HBM pass over X.
        x_in = jnp.pad(x2d.astype(jnp.bfloat16), ((0, Mp - M), (0, Kp - K)))
    else:
        # no padding needed: stream X at its stored dtype, cast in-kernel.
        x_in = x2d

    out = _pallas_matmul(x_in, rhs_padded, tm=tm, tn=tn, tk=tk,
                         out_dtype=out_dtype)
    if (Mp, Np) != (M, n_out):
        out = out[:M, :n_out]
    return out


@functools.partial(jax.jit, static_argnames=("n_out", "out_dtype"))
def _bd_apply(inputs, rhs_padded, n_out, out_dtype):
    lead = inputs.shape[:-1]
    x2d = inputs.reshape((-1, inputs.shape[-1]))
    out2d = _padded_matmul(x2d, rhs_padded, n_out, out_dtype)
    return out2d.reshape(lead + (n_out,))


def _pad_rhs(rhs):
    """Cast to bf16 and pad (K, N) up to 128-multiples — done once."""
    K, N = rhs.shape
    Kp, _ = _plan_dim(K, 128, _TILE_CAPS[2])
    Np, _ = _plan_dim(N, 128, _TILE_CAPS[1])
    rhs = rhs.astype(jnp.bfloat16)
    if (Kp, Np) != (K, N):
        rhs = jnp.pad(rhs, ((0, Kp - K), (0, Np - N)))
    return rhs


class BDModelPallas:
    """JAX/Pallas port of BD_Model (bias-free linear usable in both directions)."""

    def __init__(self, in_features, out_features, key):
        self.in_features = in_features
        self.out_features = out_features
        # kaiming_uniform_ with a=sqrt(5) => U(-1/sqrt(fan_in), 1/sqrt(fan_in))
        bound = 1.0 / math.sqrt(in_features)
        self.weight = jax.random.uniform(
            key, (out_features, in_features), dtype=jnp.float32,
            minval=-bound, maxval=bound,
        )
        # Cache both RHS layouts, bf16 + padded, once (no per-call work).
        self.weight_t_pad = _pad_rhs(self.weight.T)   # (in, out): forward RHS
        self.weight_pad = _pad_rhs(self.weight)       # (out, in): backward RHS

    def __call__(self, inputs, direction="forward", out_dtype=jnp.float32):
        if direction == "forward":
            assert inputs.shape[-1] == self.in_features
            rhs, n_out = self.weight_t_pad, self.out_features
        elif direction == "backward":
            assert inputs.shape[-1] == self.out_features
            rhs, n_out = self.weight_pad, self.in_features
        else:
            raise ValueError(direction)
        return _bd_apply(inputs, rhs, n_out, jnp.dtype(out_dtype))


if __name__ == "__main__":
    key = jax.random.PRNGKey(0)
    k_w, k_x, k_g, k_w2, k_x2 = jax.random.split(key, 5)

    # --- small shapes: single-K path, padded bf16-X path --------------------
    in_features, out_features = 32, 64
    batch, seq = 2, 8
    model = BDModelPallas(in_features, out_features, k_w)

    x = jax.random.normal(k_x, (batch, seq, in_features), dtype=jnp.float32)
    y_fwd = jax.block_until_ready(model(x, direction="forward"))

    g = jax.random.normal(k_g, (batch, seq, out_features), dtype=jnp.float32)
    y_bwd = jax.block_until_ready(model(g, direction="backward"))

    ref_fwd = x @ model.weight.T
    ref_bwd = g @ model.weight
    assert y_fwd.shape == (batch, seq, out_features)
    assert y_bwd.shape == (batch, seq, in_features)
    assert jnp.allclose(y_fwd, ref_fwd, atol=5e-2, rtol=5e-2)
    assert jnp.allclose(y_bwd, ref_bwd, atol=5e-2, rtol=5e-2)

    # bf16-output path (halves writeback; f32 accumulation inside).
    y_bf16 = jax.block_until_ready(
        model(x, direction="forward", out_dtype=jnp.bfloat16))
    assert y_bf16.dtype == jnp.bfloat16
    assert jnp.allclose(y_bf16.astype(jnp.float32), ref_fwd, atol=1e-1, rtol=1e-1)

    # --- K > tk cap: exercises multi-K accumulate-into-output + in-kernel cast
    in2, out2 = 2048, 256
    model2 = BDModelPallas(in2, out2, k_w2)
    x2 = jax.random.normal(k_x2, (batch, seq, in2), dtype=jnp.float32)
    y2 = jax.block_until_ready(model2(x2, direction="forward"))
    ref2 = x2 @ model2.weight.T
    assert y2.shape == (batch, seq, out2)
    assert jnp.allclose(y2, ref2, atol=5e-2, rtol=5e-2)

    print("KERNEL_OK")
</pallas_src>

<mosaic_0001>
module attributes {stable_mosaic.version = 11 : i64} {
  func.func @_mm_kernel_single_k(%arg0: i32, %arg1: i32, %arg2: memref<16x128xbf16, #tpu.memory_space<vmem>>, %arg3: memref<128x128xbf16, #tpu.memory_space<vmem>>, %arg4: memref<16x128xf32, #tpu.memory_space<vmem>>) attributes {dimension_semantics = [#tpu.dimension_semantics<parallel>, #tpu.dimension_semantics<parallel>], iteration_bounds = array<i64: 1, 1>, scalar_prefetch = 0 : i64, scratch_operands = 0 : i64, tpu.core_type = #tpu.core_type<tc>, window_params = [{transform_indices = @transform_0, window_bounds = array<i64: 16, 128>}, {transform_indices = @transform_1, window_bounds = array<i64: 128, 128>}, {transform_indices = @transform_2, window_bounds = array<i64: 16, 128>}]} {
    %c0 = arith.constant 0 : index
    %c0_0 = arith.constant 0 : index
    %0 = vector.load %arg2[%c0, %c0_0] : memref<16x128xbf16, #tpu.memory_space<vmem>>, vector<16x128xbf16>
    %c0_1 = arith.constant 0 : index
    %c0_2 = arith.constant 0 : index
    %1 = vector.load %arg3[%c0_1, %c0_2] : memref<128x128xbf16, #tpu.memory_space<vmem>>, vector<128x128xbf16>
    %cst = arith.constant dense<0.000000e+00> : vector<16x128xf32>
    %2 = tpu.matmul %0, %1, %cst {dimension_numbers = #tpu.dot_dimension_numbers<[1], [0], [0], [1], [0, 0, 1, 1], [], []>} : vector<16x128xbf16>, vector<128x128xbf16>, vector<16x128xf32> -> vector<16x128xf32>
    %c0_3 = arith.constant 0 : index
    %c0_4 = arith.constant 0 : index
    %3 = vector.load %arg4[%c0_3, %c0_4] : memref<16x128xf32, #tpu.memory_space<vmem>>, vector<16x128xf32>
    tpu.vector_store %arg4[%c0_3, %c0_4], %2 {strides = array<i32>} : memref<16x128xf32, #tpu.memory_space<vmem>>, vector<16x128xf32>,
    return
  }
  func.func @transform_0(%arg0: i32, %arg1: i32) -> (i32, i32) {
    %c0_i32 = arith.constant 0 : i32
    %c0_i32_0 = arith.constant 0 : i32
    return %arg0, %c0_i32 : i32, i32
  }
  func.func @transform_1(%arg0: i32, %arg1: i32) -> (i32, i32) {
    %c0_i32 = arith.constant 0 : i32
    %c0_i32_0 = arith.constant 0 : i32
    return %c0_i32, %arg1 : i32, i32
  }
  func.func @transform_2(%arg0: i32, %arg1: i32) -> (i32, i32) {
    %c0_i32 = arith.constant 0 : i32
    return %arg0, %arg1 : i32, i32
  }
}

</mosaic_0001>

<bundles_post_ra>
// kernel: _bd_apply.1
= control target key start
LH: loop header
LB: loop body
LE: loop exit
PB: predicated region body
PF: predicated region fallthrough
CT: control target
= control target key end

     0   :  { %7 = vsyncpa [#allocation3], 0  ;;  %s220_s9 = smov [#allocation2]   ;;  %s252_s0 = inlined_call_operand.vmem [shape: bf16[16,128], index: 0, kind: input, shape index: {}]   ;;  %s253_s1 = inlined_call_operand.hbm [shape: bf16[128,128], index: 1, kind: input, shape index: {}]   ;;  %s254_s2 = inlined_call_operand.vmem [shape: f32[16,128], index: 2, kind: output, shape index: {}]  }
   0x1   :  { %s15_s10 = sshll.u32 %s220_s9, 4  ;;  %s16_s10 = int_to_ptr.vmem [resolvable:$true] %s15_s10 }
   0x2   :  { %s206_s11 = scalar_lea.vmem %s16_s10, 1024  ;;  %p211_p1 = scmp.lt.s32.totalorder %s16_s10, %s16_s10 }
   0x3   :  { %p207_p0 = scmp.ne.s32.totalorder %s16_s10, %s206_s11  ;;  %p212_p2 = scmp.lt.s32.totalorder %s206_s11, %s206_s11 }
   0x5   :  { %p213_p3 = por %p212_p2, %p211_p1 }
   0x7   :  { %p214_p4 = pnand %p213_p3, %p207_p0 }
   0x9   :  { %217 = shalt.err (!%p214_p4)
}
   0xa   :  { %s221_s12 = smov 64   ;;  %s222_s13 = smov 4  }
   0xb   :  { %21 = dma.hbm_to_vmem [thread:$0]  %s253_s1, 1024, %s16_s10, [#allocation3], %s221_s12, %s221_s12, %s222_s13  }
   0xc   :  { %218 = dma.done.wait [#allocation3], 1024  }
   0xd   :  { %219 = vsyncadd [#allocation3], 4294966272  ;;  %v223_v0 = vmov 0.0   ;;  %vm224_vm0 = vmmov 0   ;;  %v189_v1 = vld [vmem:[#allocation2 + $0x38] sm:$0xff]   ;;  %v190_v2 = vld [vmem:[#allocation2 + $0x30] sm:$0xff]  }
   0xe   :  { %164 = vmatprep.subr.bf16.mxu0 %v223_v0  ;;  %180 = vmatprep.mubr.msk.bf16.mxu0 %vm224_vm0, %v223_v0  ;;  %v191_v3 = vld [vmem:[#allocation2 + $0x28] sm:$0xff]   ;;  %v192_v4 = vld [vmem:[#allocation2 + $0x20] sm:$0xff]   ;;  %v193_v5 = vld [vmem:[#allocation2 + $0x18] sm:$0xff]  }
   0xf   :  { %165 = vmatpush3.bf16.msra.mxu0 %v189_v1  ;;  %v194_v6 = vld [vmem:[#allocation2 + $0x10] sm:$0xff]   ;;  %v195_v7 = vld [vmem:[#allocation2 + $0x8] sm:$0xff]   ;;  %v196_v8 = vld [vmem:[#allocation2] sm:$0xff]  }
  0x10   :  { %166 = vmatprep.subr.bf16.mxu0 %v223_v0  ;;  %v197_v9 = vld [vmem:[%s252_s0] sm:$0xff]  }
  0x13   :  { %167 = vmatpush3.bf16.msra.mxu0 %v190_v2 }
  0x14   :  { %168 = vmatprep.subr.bf16.mxu0 %v223_v0 }
  0x17   :  { %169 = vmatpush3.bf16.msra.mxu0 %v191_v3 }
  0x18   :  { %170 = vmatprep.subr.bf16.mxu0 %v223_v0 }
  0x1b   :  { %171 = vmatpush3.bf16.msra.mxu0 %v192_v4 }
  0x1c   :  { %172 = vmatprep.subr.bf16.mxu0 %v223_v0 }
  0x1f   :  { %173 = vmatpush3.bf16.msra.mxu0 %v193_v5 }
  0x20   :  { %174 = vmatprep.subr.bf16.mxu0 %v223_v0 }
  0x23   :  { %175 = vmatpush3.bf16.msra.mxu0 %v194_v6 }
  0x24   :  { %176 = vmatprep.subr.bf16.mxu0 %v223_v0 }
  0x27   :  { %177 = vmatpush3.bf16.msra.mxu0 %v195_v7 }
  0x28   :  { %178 = vmatprep.subr.bf16.mxu0 %v223_v0 }
  0x2b   :  { %179 = vmatpush3.bf16.msra.mxu0 %v196_v8 }
  0x2e   :  { %181 = vmatmul.mubr.bf16.vlgmr.msra.gmra.mxu0 %v197_v9 }
  0xee   :  { %v132_v10 = vpop.f32.mrf.mxu0 }
  0xef   :  { %139 = vst [vmem:[%s254_s2] sm:$0xff] %v132_v10 }
  0xf0   :  { %v182_v11 = vpop.f32.mrf.mxu0 }
  0xf2   :  { %v135_v12 = vpop.f32.mrf.mxu0 }
  0xf3   :  { %140 = vst [vmem:[%s254_s2 + $0x8] sm:$0xff] %v135_v12 }
  0xf4   :  { %v183_v13 = vpop.f32.mrf.mxu0 }
  0xf5   :  { %145 = vsyncpa [#allocation3], 1 }

</bundles_post_ra>
